<compile_context>
chip_gen: v6e
topology: v6e:2x2x1
jax: 0.10.0
libtpu: 0.0.40
codegen_flags: <defaults>
</compile_context>

<pallas_src>
import functools

import jax
import jax.numpy as jnp
from jax.experimental import pallas as pl
from jax.experimental.pallas import tpu as pltpu


def _cdiv(a, b):
    return (a + b - 1) // b


def _round_up(a, b):
    return _cdiv(a, b) * b


def _vmem_capacity_bytes():
    """Best-effort query of per-core VMEM capacity; conservative fallback."""
    try:
        info = pltpu.get_tpu_info()
        cap = getattr(info, "vmem_capacity_bytes", None)
        if cap:
            return int(cap)
    except Exception:
        pass
    try:
        kind = jax.devices()[0].device_kind.lower()
        if "v5" in kind or "v6" in kind:
            return 128 * 1024 * 1024
    except Exception:
        pass
    return 64 * 1024 * 1024  # conservative: v7x per-TC VMEM


def _gap_kernel(x_ref, o_ref, acc_ref, *, hw, hw_blk, inv_hw, has_tail):
    # x_ref: (TM, hw_blk) input tile, o_ref: (TM, 1), acc_ref: (TM, 1) f32 scratch.
    k = pl.program_id(1)
    last = pl.num_programs(1) - 1

    @pl.when(k == 0)
    def _init():
        acc_ref[...] = jnp.zeros_like(acc_ref)

    if has_tail:
        # Only the final HW chunk is partial; keep the hot loop mask-free and pay the
        # iota/compare/select cost exactly once.
        @pl.when(k < last)
        def _body():
            acc_ref[...] += jnp.sum(
                x_ref[...], axis=-1, dtype=jnp.float32, keepdims=True
            )

        @pl.when(k == last)
        def _tail():
            x = x_ref[...]
            col = jax.lax.broadcasted_iota(jnp.int32, x.shape, 1) + k * hw_blk
            x = jnp.where(col < hw, x, jnp.zeros_like(x))
            acc_ref[...] += jnp.sum(x, axis=-1, dtype=jnp.float32, keepdims=True)
    else:
        # Chunk size divides H*W (or there is a single full-width block): no mask.
        acc_ref[...] += jnp.sum(
            x_ref[...], axis=-1, dtype=jnp.float32, keepdims=True
        )

    @pl.when(k == last)
    def _finalize():
        o_ref[...] = (acc_ref[...] * inv_hw).astype(o_ref.dtype)


def global_avg_pool2d(x):
    """x: (N, C, H, W) -> (N, C, 1, 1), mean over H and W."""
    N, C, H, W = x.shape
    nc = N * C
    hw = H * W
    x2 = x.reshape(nc, hw)

    itemsize = jnp.dtype(x.dtype).itemsize
    # Sub-32-bit dtypes pack along sublanes: align NC tiles to 8/16/32 rows.
    sub = max(8, 32 // itemsize)

    # --- generation-aware VMEM budget -----------------------------------------
    vmem_cap = _vmem_capacity_bytes()
    if vmem_cap >= 100 * 1024 * 1024:        # v5e / v6e: 128 MiB physical VMEM
        per_buf = 16 * 1024 * 1024
        vmem_limit = 64 * 1024 * 1024
    else:                                     # v7x: 64 MiB per TensorCore
        per_buf = 8 * 1024 * 1024
        vmem_limit = 48 * 1024 * 1024

    # --- HW (reduction) chunk size ---------------------------------------------
    hw_pad = _round_up(hw, 128)               # VMEM/vregs hold the lane-padded tile
    if per_buf // (hw_pad * itemsize) >= sub:
        # Whole reduction fits in a single lane-dim block for at least `sub` rows.
        hw_blk = hw
    else:
        # Very large images: chunk HW. Prefer a 128-multiple that divides hw evenly
        # (no partial last block, no per-step mask); otherwise fall back to the
        # largest 128-aligned chunk within budget.
        max_blk = max(128, (per_buf // (sub * itemsize)) // 128 * 128)
        hw_blk = 0
        for m in range(max_blk // 128, 0, -1):
            cand = m * 128
            if hw % cand == 0:
                hw_blk = cand
                break
        if hw_blk == 0:
            hw_blk = max_blk

    has_tail = (hw % hw_blk) != 0
    hw_blk_pad = _round_up(hw_blk, 128)

    # --- NC tile size (byte-based, no fixed row cap) ----------------------------
    tm = per_buf // (hw_blk_pad * itemsize)
    if tm >= nc:
        if nc >= 2 * sub:
            # Force >= 2 NC blocks so both TensorCores get work on multi-core chips
            # (v7x); harmless on single-core chips.
            tm = _round_up(_cdiv(nc, 2), sub)
        else:
            tm = nc                            # full dim == layout-legal single block
    else:
        tm = max(sub, (tm // sub) * sub)       # sublane-aligned, budget-capped

    grid = (_cdiv(nc, tm), _cdiv(hw, hw_blk))

    kernel = functools.partial(
        _gap_kernel, hw=hw, hw_blk=hw_blk, inv_hw=1.0 / hw, has_tail=has_tail
    )

    out = pl.pallas_call(
        kernel,
        out_shape=jax.ShapeDtypeStruct((nc, 1), x.dtype),
        grid_spec=pltpu.PrefetchScalarGridSpec(
            num_scalar_prefetch=0,
            grid=grid,
            in_specs=[pl.BlockSpec((tm, hw_blk), lambda i, k: (i, k))],
            out_specs=pl.BlockSpec((tm, 1), lambda i, k: (i, 0)),
            scratch_shapes=[pltpu.VMEM((tm, 1), jnp.float32)],
        ),
        compiler_params=pltpu.CompilerParams(
            # NC tiles are independent -> parallel (shards across v7x's 2 TCs);
            # HW chunks accumulate into the scratch -> arbitrary (last axis).
            dimension_semantics=("parallel", "arbitrary"),
            vmem_limit_bytes=vmem_limit,
        ),
    )(x2)

    return out.reshape(N, C, 1, 1)


if __name__ == "__main__":
    key = jax.random.PRNGKey(0)
    x = jax.random.normal(key, (2, 4, 16, 16), dtype=jnp.float32)

    y = global_avg_pool2d(x)
    jax.block_until_ready(y)

    # reference check against plain JAX mean
    y_ref = jnp.mean(x, axis=(2, 3), keepdims=True)
    assert y.shape == (2, 4, 1, 1), y.shape
    assert jnp.allclose(y, y_ref, atol=1e-5, rtol=1e-5)

    print("KERNEL_OK")
</pallas_src>

<mosaic_0001>
module attributes {stable_mosaic.version = 11 : i64} {
  func.func @_gap_kernel(%arg0: i32, %arg1: i32, %arg2: memref<8x256xf32, #tpu.memory_space<vmem>>, %arg3: memref<8x1xf32, #tpu.memory_space<vmem>>, %arg4: memref<8x1xf32, #tpu.memory_space<vmem>>) attributes {dimension_semantics = [#tpu.dimension_semantics<parallel>, #tpu.dimension_semantics<arbitrary>], iteration_bounds = array<i64: 1, 1>, scalar_prefetch = 0 : i64, scratch_operands = 1 : i64, tpu.core_type = #tpu.core_type<tc>, window_params = [{transform_indices = @transform_0, window_bounds = array<i64: 8, 256>}, {transform_indices = @transform_1, window_bounds = array<i64: 8, 1>}]} {
    %c0_i32 = arith.constant 0 : i32
    %0 = arith.cmpi eq, %arg1, %c0_i32 : i32
    %1 = arith.extui %0 : i1 to i32
    %c0_i32_0 = arith.constant 0 : i32
    %2 = arith.cmpi ne, %1, %c0_i32_0 : i32
    scf.if %2 {
      %cst_8 = arith.constant 0.000000e+00 : f32
      %12 = vector.broadcast %cst_8 : f32 to vector<8x1xf32>
      %c0_9 = arith.constant 0 : index
      %c0_10 = arith.constant 0 : index
      %13 = vector.load %arg4[%c0_9, %c0_10] : memref<8x1xf32, #tpu.memory_space<vmem>>, vector<8x1xf32>
      tpu.vector_store %arg4[%c0_9, %c0_10], %12 {strides = array<i32>} : memref<8x1xf32, #tpu.memory_space<vmem>>, vector<8x1xf32>,
    } else {
    }
    %c0 = arith.constant 0 : index
    %c0_1 = arith.constant 0 : index
    %3 = vector.load %arg4[%c0, %c0_1] : memref<8x1xf32, #tpu.memory_space<vmem>>, vector<8x1xf32>
    %c0_2 = arith.constant 0 : index
    %c0_3 = arith.constant 0 : index
    %4 = vector.load %arg2[%c0_2, %c0_3] : memref<8x256xf32, #tpu.memory_space<vmem>>, vector<8x256xf32>
    %cst = arith.constant dense<0.000000e+00> : vector<8xf32>
    %5 = vector.multi_reduction <add>, %4, %cst [1] : vector<8x256xf32> to vector<8xf32>
    %6 = vector.shape_cast %5 : vector<8xf32> to vector<8x1xf32>
    %7 = arith.addf %3, %6 : vector<8x1xf32>
    %c0_4 = arith.constant 0 : index
    %c0_5 = arith.constant 0 : index
    %8 = vector.load %arg4[%c0_4, %c0_5] : memref<8x1xf32, #tpu.memory_space<vmem>>, vector<8x1xf32>
    tpu.vector_store %arg4[%c0_4, %c0_5], %7 {strides = array<i32>} : memref<8x1xf32, #tpu.memory_space<vmem>>, vector<8x1xf32>,
    %c0_i32_6 = arith.constant 0 : i32
    %9 = arith.cmpi eq, %arg1, %c0_i32_6 : i32
    %10 = arith.extui %9 : i1 to i32
    %c0_i32_7 = arith.constant 0 : i32
    %11 = arith.cmpi ne, %10, %c0_i32_7 : i32
    scf.if %11 {
      %c0_8 = arith.constant 0 : index
      %c0_9 = arith.constant 0 : index
      %12 = vector.load %arg4[%c0_8, %c0_9] : memref<8x1xf32, #tpu.memory_space<vmem>>, vector<8x1xf32>
      %cst_10 = arith.constant 3.906250e-03 : f32
      %13 = vector.broadcast %cst_10 : f32 to vector<8x1xf32>
      %14 = arith.mulf %12, %13 : vector<8x1xf32>
      %c0_11 = arith.constant 0 : index
      %c0_12 = arith.constant 0 : index
      %15 = vector.load %arg3[%c0_11, %c0_12] : memref<8x1xf32, #tpu.memory_space<vmem>>, vector<8x1xf32>
      tpu.vector_store %arg3[%c0_11, %c0_12], %14 {strides = array<i32>} : memref<8x1xf32, #tpu.memory_space<vmem>>, vector<8x1xf32>,
    } else {
    }
    return
  }
  func.func @transform_0(%arg0: i32, %arg1: i32) -> (i32, i32) {
    %c0_i32 = arith.constant 0 : i32
    return %arg0, %arg1 : i32, i32
  }
  func.func @transform_1(%arg0: i32, %arg1: i32) -> (i32, i32) {
    %c0_i32 = arith.constant 0 : i32
    %c0_i32_0 = arith.constant 0 : i32
    return %arg0, %c0_i32 : i32, i32
  }
}

</mosaic_0001>

<bundles_post_ra>
// kernel: tpu_custom_call.1
= control target key start
LH: loop header
LB: loop body
LE: loop exit
PB: predicated region body
PF: predicated region fallthrough
CT: control target
= control target key end

     0   :  { %6 = vsyncpa [#allocation4], 0  ;;  %s70_s6 = smov [#allocation3]   ;;  %s88_s0 = inlined_call_operand.hbm [shape: f32[8,256], index: 0, kind: input, shape index: {}]   ;;  %s89_s1 = inlined_call_operand.vmem [shape: f32[8,1], index: 1, kind: output, shape index: {}]  }
   0x1   :  { %s13_s7 = sshll.u32 %s70_s6, 4  ;;  %s14_s7 = int_to_ptr.vmem [resolvable:$true] %s13_s7 }
   0x2   :  { %s56_s8 = scalar_lea.vmem %s14_s7, 256  ;;  %p61_p1 = scmp.lt.s32.totalorder %s14_s7, %s14_s7 }
   0x3   :  { %p57_p0 = scmp.ne.s32.totalorder %s14_s7, %s56_s8  ;;  %p62_p2 = scmp.lt.s32.totalorder %s56_s8, %s56_s8 }
   0x5   :  { %p63_p3 = por %p62_p2, %p61_p1 }
   0x7   :  { %p64_p4 = pnand %p63_p3, %p57_p0 }
   0x9   :  { %67 = shalt.err (!%p64_p4)
}
   0xa   :  { %16 = dma.hbm_to_vmem [thread:$0]  %s88_s0, 256, %s14_s7, [#allocation4]  }
   0xb   :  { %68 = dma.done.wait [#allocation4], 256  }
   0xc   :  { %69 = vsyncadd [#allocation4], 4294967040  ;;  %vm24_vm0 = vcmask 7168   ;;  %v71_v0 = vmov 0.0   ;;  %v27_v1 = vld [vmem:[#allocation3] sm:$0xff]  ;;  %v28_v2 = vld [vmem:[#allocation3 + $0x8] sm:$0xff] }
   0xd   :  { %25 = vst.msk [vmem:[#allocation2] sm:$0xff] %vm24_vm0, %v71_v0  ;;  %v29_v3 = vadd.f32 %v28_v2, %v27_v1 }
   0xf   :  { %30 = vadd.xlane.f32.xlu0 %v29_v3 }
  0x14   :  { %v26_v4 = vld [vmem:[#allocation2] sm:$0xff] }
  0x98   :  { %v31_v5 = vpop.xlane.xlu0 %30 }
  0x99   :  { %v32_v6 = vadd.f32 %v31_v5, %v26_v4 }
  0x9b   :  { %34 = vst.msk [vmem:[#allocation2] sm:$0xff] %vm24_vm0, %v32_v6 }
  0xa2   :  { %v38_v7 = vld [vmem:[#allocation2] sm:$0xff] }
  0xa3   :  { %v39_v8 = vmul.f32 0.00390625, %v38_v7 }
  0xa5   :  { %40 = vst.msk [vmem:[%s89_s1] sm:$0xff] %vm24_vm0, %v39_v8 }
  0xa6   :  { %45 = vsyncpa [#allocation4], 1 }

</bundles_post_ra>
